<compile_context>
chip_gen: v6e
topology: v6e:2x2x1
jax: 0.10.0
libtpu: 0.0.40
codegen_flags: <defaults>
</compile_context>

<pallas_src>
import jax
import jax.numpy as jnp
from jax.experimental import pallas as pl
from jax.experimental.pallas import tpu as pltpu


def _obs_fusion_kernel(appear_ref, reproj_ref, odesc_ref, w1_ref, w2_ref,
                       bias_ref, at_ref, rt_ref, out_ref):
    at = at_ref[0]
    rt = rt_ref[0]

    # --- appearance branch: softmax over TQ (sublane axis 0 of (TQ, R)) ---
    a_log = at * appear_ref[...]
    a_log = a_log - jnp.max(a_log, axis=0, keepdims=True)
    a_exp = jnp.exp(a_log)
    a_sm = a_exp * pl.reciprocal(jnp.sum(a_exp, axis=0, keepdims=True),
                                 approx=True)

    # --- reprojection branch: exp(-log(x+eps)) == 1/(x+eps); one EUP op ---
    r_val = pl.reciprocal(reproj_ref[...] + 1.2e-05, approx=False)
    r_log = rt * r_val
    r_log = r_log - jnp.max(r_log, axis=0, keepdims=True)
    r_exp = jnp.exp(r_log)
    r_sm = r_exp * pl.reciprocal(jnp.sum(r_exp, axis=0, keepdims=True),
                                 approx=True)

    # --- fold the 1x1 conv into the descriptor projection, in-kernel ---
    # P1 = W1 @ od, P2 = W2 @ od -> (in_c, TQ);  out = P1 @ A + P2 @ Rm + b
    od = odesc_ref[...].astype(jnp.bfloat16)                 # (F, TQ)
    p1 = jnp.dot(w1_ref[...], od, preferred_element_type=jnp.float32)
    p2 = jnp.dot(w2_ref[...], od, preferred_element_type=jnp.float32)

    out = (jnp.dot(p1.astype(jnp.bfloat16), a_sm.astype(jnp.bfloat16),
                   preferred_element_type=jnp.float32)
           + jnp.dot(p2.astype(jnp.bfloat16), r_sm.astype(jnp.bfloat16),
                     preferred_element_type=jnp.float32)
           + bias_ref[...])                                  # (in_c, R)
    out_ref[...] = out.astype(out_ref.dtype)


def obs_fusion(appear_o2r_score, reproj_o2r_score, o_desc,
               conv_w, conv_b, appear_t, rpj_t):
    """appear/reproj: (B, TQ, R); o_desc: (B, F, TQ);
       conv_w: (in_c, 2*F, 1); conv_b: (in_c,); appear_t/rpj_t: (1,)."""
    B, TQ, R = appear_o2r_score.shape
    Fdim = o_desc.shape[1]
    in_c = conv_w.shape[0]

    # Parameter-side prep only (tiny, one slice + cast): W = [W1 | W2].
    w = conv_w[:, :, 0]
    w1 = w[:, :Fdim].astype(jnp.bfloat16)                    # (in_c, F)
    w2 = w[:, Fdim:].astype(jnp.bfloat16)                    # (in_c, F)
    bias = conv_b.reshape(in_c, 1).astype(jnp.float32)
    at = jnp.asarray(appear_t, jnp.float32).reshape(1)
    rt = jnp.asarray(rpj_t, jnp.float32).reshape(1)

    grid_spec = pltpu.PrefetchScalarGridSpec(
        num_scalar_prefetch=0,
        grid=(B,),
        in_specs=[
            pl.BlockSpec((None, TQ, R), lambda b: (b, 0, 0)),     # appear
            pl.BlockSpec((None, TQ, R), lambda b: (b, 0, 0)),     # reproj
            pl.BlockSpec((None, Fdim, TQ), lambda b: (b, 0, 0)),  # o_desc
            pl.BlockSpec((in_c, Fdim), lambda b: (0, 0)),         # W1 (invariant)
            pl.BlockSpec((in_c, Fdim), lambda b: (0, 0)),         # W2 (invariant)
            pl.BlockSpec((in_c, 1), lambda b: (0, 0)),            # bias (invariant)
            pl.BlockSpec(memory_space=pltpu.SMEM),                # appear_t
            pl.BlockSpec(memory_space=pltpu.SMEM),                # rpj_t
        ],
        out_specs=pl.BlockSpec((None, in_c, R), lambda b: (b, 0, 0)),
    )

    # TODO(synk): if TQ or R grow beyond VMEM-friendly sizes, add an R tile
    # axis (softmax over TQ is R-independent, so tiling R is trivial).
    return pl.pallas_call(
        _obs_fusion_kernel,
        out_shape=jax.ShapeDtypeStruct((B, in_c, R), jnp.float32),
        grid_spec=grid_spec,
        compiler_params=pltpu.CompilerParams(
            dimension_semantics=("parallel",)),
    )(appear_o2r_score.astype(jnp.float32),
      reproj_o2r_score.astype(jnp.float32),
      o_desc.astype(jnp.float32),
      w1, w2, bias, at, rt)


def obs_fusion_ref(appear, reproj, o_desc, conv_w, conv_b, appear_t, rpj_t):
    """Plain-JAX reference matching the PyTorch forward (full f32)."""
    rpj = jnp.exp(-jnp.log(reproj + 1.2e-05))
    a_sm = jax.nn.softmax(appear_t * appear, axis=1)
    r_sm = jax.nn.softmax(rpj_t * rpj, axis=1)
    af = jnp.einsum('bfq,bqr->bfr', o_desc, a_sm)
    rf = jnp.einsum('bfq,bqr->bfr', o_desc, r_sm)
    x = jnp.concatenate([af, rf], axis=1)             # (B, 2F, R)
    w = conv_w[:, :, 0]                               # (in_c, 2F)
    return jnp.einsum('oi,bir->bor', w, x) + conv_b[None, :, None]


if __name__ == "__main__":
    # Small shapes consistent with the module (in_c=F, num_obs=2).
    B, TQ, R, in_c = 2, 16, 128, 32
    beta_init = 0.5

    key = jax.random.PRNGKey(0)
    k1, k2, k3, k4, k5 = jax.random.split(key, 5)

    appear = jax.random.normal(k1, (B, TQ, R), dtype=jnp.float32)
    # reprojection scores are positive distances (log / reciprocal taken)
    reproj = jax.random.uniform(k2, (B, TQ, R), dtype=jnp.float32,
                                minval=0.05, maxval=2.0)
    o_desc = jax.random.normal(k3, (B, in_c, TQ), dtype=jnp.float32)

    # Deterministic parameter init (Conv1d(in_c*num_obs -> in_c, k=1)).
    conv_w = jax.random.normal(k4, (in_c, in_c * 2, 1), dtype=jnp.float32) * 0.05
    conv_b = jax.random.normal(k5, (in_c,), dtype=jnp.float32) * 0.05
    appear_t = jnp.ones((1,), jnp.float32) * beta_init
    rpj_t = jnp.ones((1,), jnp.float32) * beta_init

    out = obs_fusion(appear, reproj, o_desc, conv_w, conv_b, appear_t, rpj_t)
    out = jax.block_until_ready(out)

    ref = obs_fusion_ref(appear, reproj, o_desc, conv_w, conv_b,
                         appear_t, rpj_t)
    assert out.shape == (B, in_c, R)
    # Tolerance accounts for bf16 MXU operands and approx EUP reciprocals.
    max_err = jnp.max(jnp.abs(out - ref))
    assert jnp.allclose(out, ref, atol=2e-2, rtol=2e-2), \
        f"max err {max_err}"

    print("KERNEL_OK")
</pallas_src>

<mosaic_0001>
module attributes {stable_mosaic.version = 11 : i64} {
  func.func @_obs_fusion_kernel(%arg0: i32, %arg1: memref<1x16x128xf32, #tpu.memory_space<vmem>>, %arg2: memref<1x16x128xf32, #tpu.memory_space<vmem>>, %arg3: memref<1x32x16xf32, #tpu.memory_space<vmem>>, %arg4: memref<32x32xbf16, #tpu.memory_space<vmem>>, %arg5: memref<32x32xbf16, #tpu.memory_space<vmem>>, %arg6: memref<32x1xf32, #tpu.memory_space<vmem>>, %arg7: memref<1xf32, #tpu.memory_space<smem>>, %arg8: memref<1xf32, #tpu.memory_space<smem>>, %arg9: memref<1x32x128xf32, #tpu.memory_space<vmem>>) attributes {dimension_semantics = [#tpu.dimension_semantics<parallel>], iteration_bounds = array<i64: 2>, scalar_prefetch = 0 : i64, scratch_operands = 0 : i64, tpu.core_type = #tpu.core_type<tc>, window_params = [{transform_indices = @transform_0, window_bounds = array<i64: 1, 16, 128>}, {transform_indices = @transform_1, window_bounds = array<i64: 1, 16, 128>}, {transform_indices = @transform_2, window_bounds = array<i64: 1, 32, 16>}, {pipeline_mode = #tpu.pipeline_mode<synchronous>, transform_indices = @transform_3, window_bounds = array<i64: 32, 32>}, {pipeline_mode = #tpu.pipeline_mode<synchronous>, transform_indices = @transform_4, window_bounds = array<i64: 32, 32>}, {pipeline_mode = #tpu.pipeline_mode<synchronous>, transform_indices = @transform_5, window_bounds = array<i64: 32, 1>}, {transform_indices = @transform_6, window_bounds = array<i64: 1>}, {transform_indices = @transform_7, window_bounds = array<i64: 1>}, {transform_indices = @transform_8, window_bounds = array<i64: 1, 32, 128>}]} {
    %c0 = arith.constant 0 : index
    %0 = memref.load %arg7[%c0] : memref<1xf32, #tpu.memory_space<smem>>
    %c0_0 = arith.constant 0 : index
    %1 = memref.load %arg8[%c0_0] : memref<1xf32, #tpu.memory_space<smem>>
    %c0_1 = arith.constant 0 : index
    %c0_2 = arith.constant 0 : index
    %c0_3 = arith.constant 0 : index
    %2 = vector.load %arg1[%c0_1, %c0_2, %c0_3] : memref<1x16x128xf32, #tpu.memory_space<vmem>>, vector<1x16x128xf32>
    %3 = vector.shape_cast %2 : vector<1x16x128xf32> to vector<16x128xf32>
    %4 = vector.broadcast %0 : f32 to vector<16x128xf32>
    %5 = arith.mulf %4, %3 : vector<16x128xf32>
    %cst = arith.constant dense<0xFF800000> : vector<128xf32>
    %6 = vector.multi_reduction <maximumf>, %5, %cst [0] : vector<16x128xf32> to vector<128xf32>
    %7 = vector.shape_cast %6 : vector<128xf32> to vector<1x128xf32>
    %8 = vector.broadcast %7 : vector<1x128xf32> to vector<16x128xf32>
    %9 = arith.subf %5, %8 : vector<16x128xf32>
    %10 = math.exp %9 : vector<16x128xf32>
    %cst_4 = arith.constant dense<0.000000e+00> : vector<128xf32>
    %11 = vector.multi_reduction <add>, %10, %cst_4 [0] : vector<16x128xf32> to vector<128xf32>
    %12 = vector.shape_cast %11 : vector<128xf32> to vector<1x128xf32>
    %13 = tpu.reciprocal %12 {approx = true} : vector<1x128xf32> -> vector<1x128xf32>
    %14 = vector.broadcast %13 : vector<1x128xf32> to vector<16x128xf32>
    %15 = arith.mulf %10, %14 : vector<16x128xf32>
    %c0_5 = arith.constant 0 : index
    %c0_6 = arith.constant 0 : index
    %c0_7 = arith.constant 0 : index
    %16 = vector.load %arg2[%c0_5, %c0_6, %c0_7] : memref<1x16x128xf32, #tpu.memory_space<vmem>>, vector<1x16x128xf32>
    %17 = vector.shape_cast %16 : vector<1x16x128xf32> to vector<16x128xf32>
    %cst_8 = arith.constant 1.200000e-05 : f32
    %18 = vector.broadcast %cst_8 : f32 to vector<16x128xf32>
    %19 = arith.addf %17, %18 : vector<16x128xf32>
    %20 = tpu.reciprocal %19 : vector<16x128xf32> -> vector<16x128xf32>
    %21 = vector.broadcast %1 : f32 to vector<16x128xf32>
    %22 = arith.mulf %21, %20 : vector<16x128xf32>
    %cst_9 = arith.constant dense<0xFF800000> : vector<128xf32>
    %23 = vector.multi_reduction <maximumf>, %22, %cst_9 [0] : vector<16x128xf32> to vector<128xf32>
    %24 = vector.shape_cast %23 : vector<128xf32> to vector<1x128xf32>
    %25 = vector.broadcast %24 : vector<1x128xf32> to vector<16x128xf32>
    %26 = arith.subf %22, %25 : vector<16x128xf32>
    %27 = math.exp %26 : vector<16x128xf32>
    %cst_10 = arith.constant dense<0.000000e+00> : vector<128xf32>
    %28 = vector.multi_reduction <add>, %27, %cst_10 [0] : vector<16x128xf32> to vector<128xf32>
    %29 = vector.shape_cast %28 : vector<128xf32> to vector<1x128xf32>
    %30 = tpu.reciprocal %29 {approx = true} : vector<1x128xf32> -> vector<1x128xf32>
    %31 = vector.broadcast %30 : vector<1x128xf32> to vector<16x128xf32>
    %32 = arith.mulf %27, %31 : vector<16x128xf32>
    %c0_11 = arith.constant 0 : index
    %c0_12 = arith.constant 0 : index
    %c0_13 = arith.constant 0 : index
    %33 = vector.load %arg3[%c0_11, %c0_12, %c0_13] : memref<1x32x16xf32, #tpu.memory_space<vmem>>, vector<1x32x16xf32>
    %34 = vector.shape_cast %33 : vector<1x32x16xf32> to vector<32x16xf32>
    %35 = arith.truncf %34 : vector<32x16xf32> to vector<32x16xbf16>
    %c0_14 = arith.constant 0 : index
    %c0_15 = arith.constant 0 : index
    %36 = vector.load %arg4[%c0_14, %c0_15] : memref<32x32xbf16, #tpu.memory_space<vmem>>, vector<32x32xbf16>
    %cst_16 = arith.constant dense<0.000000e+00> : vector<32x16xf32>
    %37 = tpu.matmul %36, %35, %cst_16 {dimension_numbers = #tpu.dot_dimension_numbers<[1], [0], [0], [1], [0, 0, 1, 1], [], []>} : vector<32x32xbf16>, vector<32x16xbf16>, vector<32x16xf32> -> vector<32x16xf32>
    %c0_17 = arith.constant 0 : index
    %c0_18 = arith.constant 0 : index
    %38 = vector.load %arg5[%c0_17, %c0_18] : memref<32x32xbf16, #tpu.memory_space<vmem>>, vector<32x32xbf16>
    %cst_19 = arith.constant dense<0.000000e+00> : vector<32x16xf32>
    %39 = tpu.matmul %38, %35, %cst_19 {dimension_numbers = #tpu.dot_dimension_numbers<[1], [0], [0], [1], [0, 0, 1, 1], [], []>} : vector<32x32xbf16>, vector<32x16xbf16>, vector<32x16xf32> -> vector<32x16xf32>
    %40 = arith.truncf %37 : vector<32x16xf32> to vector<32x16xbf16>
    %41 = arith.truncf %15 : vector<16x128xf32> to vector<16x128xbf16>
    %cst_20 = arith.constant dense<0.000000e+00> : vector<32x128xf32>
    %42 = tpu.matmul %40, %41, %cst_20 {dimension_numbers = #tpu.dot_dimension_numbers<[1], [0], [0], [1], [0, 0, 1, 1], [], []>} : vector<32x16xbf16>, vector<16x128xbf16>, vector<32x128xf32> -> vector<32x128xf32>
    %43 = arith.truncf %39 : vector<32x16xf32> to vector<32x16xbf16>
    %44 = arith.truncf %32 : vector<16x128xf32> to vector<16x128xbf16>
    %cst_21 = arith.constant dense<0.000000e+00> : vector<32x128xf32>
    %45 = tpu.matmul %43, %44, %cst_21 {dimension_numbers = #tpu.dot_dimension_numbers<[1], [0], [0], [1], [0, 0, 1, 1], [], []>} : vector<32x16xbf16>, vector<16x128xbf16>, vector<32x128xf32> -> vector<32x128xf32>
    %46 = arith.addf %42, %45 : vector<32x128xf32>
    %c0_22 = arith.constant 0 : index
    %c0_23 = arith.constant 0 : index
    %47 = vector.load %arg6[%c0_22, %c0_23] : memref<32x1xf32, #tpu.memory_space<vmem>>, vector<32x1xf32>
    %48 = vector.broadcast %47 : vector<32x1xf32> to vector<32x128xf32>
    %49 = arith.addf %46, %48 : vector<32x128xf32>
    %c0_24 = arith.constant 0 : index
    %c0_25 = arith.constant 0 : index
    %c0_26 = arith.constant 0 : index
    %50 = vector.load %arg9[%c0_24, %c0_25, %c0_26] : memref<1x32x128xf32, #tpu.memory_space<vmem>>, vector<1x32x128xf32>
    %51 = vector.shape_cast %50 : vector<1x32x128xf32> to vector<32x128xf32>
    %52 = vector.shape_cast %49 : vector<32x128xf32> to vector<1x32x128xf32>
    tpu.vector_store %arg9[%c0_24, %c0_25, %c0_26], %52 {strides = array<i32>} : memref<1x32x128xf32, #tpu.memory_space<vmem>>, vector<1x32x128xf32>,
    return
  }
  func.func @transform_0(%arg0: i32) -> (i32, i32, i32) {
    %c0_i32 = arith.constant 0 : i32
    %c0_i32_0 = arith.constant 0 : i32
    %c0_i32_1 = arith.constant 0 : i32
    return %arg0, %c0_i32, %c0_i32_0 : i32, i32, i32
  }
  func.func @transform_1(%arg0: i32) -> (i32, i32, i32) {
    %c0_i32 = arith.constant 0 : i32
    %c0_i32_0 = arith.constant 0 : i32
    %c0_i32_1 = arith.constant 0 : i32
    return %arg0, %c0_i32, %c0_i32_0 : i32, i32, i32
  }
  func.func @transform_2(%arg0: i32) -> (i32, i32, i32) {
    %c0_i32 = arith.constant 0 : i32
    %c0_i32_0 = arith.constant 0 : i32
    %c0_i32_1 = arith.constant 0 : i32
    return %arg0, %c0_i32, %c0_i32_0 : i32, i32, i32
  }
  func.func @transform_3(%arg0: i32) -> (i32, i32) {
    %c0_i32 = arith.constant 0 : i32
    %c0_i32_0 = arith.constant 0 : i32
    %c0_i32_1 = arith.constant 0 : i32
    return %c0_i32, %c0_i32_0 : i32, i32
  }
  func.func @transform_4(%arg0: i32) -> (i32, i32) {
    %c0_i32 = arith.constant 0 : i32
    %c0_i32_0 = arith.constant 0 : i32
    %c0_i32_1 = arith.constant 0 : i32
    return %c0_i32, %c0_i32_0 : i32, i32
  }
  func.func @transform_5(%arg0: i32) -> (i32, i32) {
    %c0_i32 = arith.constant 0 : i32
    %c0_i32_0 = arith.constant 0 : i32
    %c0_i32_1 = arith.constant 0 : i32
    return %c0_i32, %c0_i32_0 : i32, i32
  }
  func.func @transform_6(%arg0: i32) -> i32 {
    %c0_i32 = arith.constant 0 : i32
    %c0_i32_0 = arith.constant 0 : i32
    return %c0_i32 : i32
  }
  func.func @transform_7(%arg0: i32) -> i32 {
    %c0_i32 = arith.constant 0 : i32
    %c0_i32_0 = arith.constant 0 : i32
    return %c0_i32 : i32
  }
  func.func @transform_8(%arg0: i32) -> (i32, i32, i32) {
    %c0_i32 = arith.constant 0 : i32
    %c0_i32_0 = arith.constant 0 : i32
    %c0_i32_1 = arith.constant 0 : i32
    return %arg0, %c0_i32, %c0_i32_0 : i32, i32, i32
  }
}

</mosaic_0001>

<bundles_post_ra>
// kernel: tpu_custom_call.1
= control target key start
LH: loop header
LB: loop body
LE: loop exit
PB: predicated region body
PF: predicated region fallthrough
CT: control target
= control target key end

     0   :  { %s1201_s0 = inlined_call_operand.vmem [shape: f32[2,16,128], index: 0, kind: input, shape index: {}]   ;;  %s1202_s1 = inlined_call_operand.vmem [shape: f32[2,16,128], index: 1, kind: input, shape index: {}]   ;;  %s1203_s2 = inlined_call_operand.vmem [shape: f32[2,32,16], index: 2, kind: input, shape index: {}]   ;;  %s1204_s3 = inlined_call_operand.vmem [shape: bf16[32,32], index: 3, kind: input, shape index: {}]   ;;  %s1205_s4 = inlined_call_operand.vmem [shape: bf16[32,32], index: 4, kind: input, shape index: {}]   ;;  %s1206_s5 = inlined_call_operand.vmem [shape: f32[32,1], index: 5, kind: input, shape index: {}]   ;;  %s1207_s6 = inlined_call_operand.<no memory space> [shape: f32[1], index: 6, kind: input, shape index: {}]   ;;  %s1208_s7 = inlined_call_operand.<no memory space> [shape: f32[1], index: 7, kind: input, shape index: {}]   ;;  %s1209_s8 = inlined_call_operand.hbm [shape: f32[2,32,128], index: 8, kind: output, shape index: {}]  }
   0x1   :  { %13 = sst [smem:[#allocation2]] %s1207_s6 }
   0x2   :  { %14 = sst [smem:[#allocation3]] %s1208_s7 }
   0x3   :  { %15 = vsyncpa [#allocation5], 0 }
   0x4   :  { %17 = vsyncpa [#allocation5 + $0x1], 0  ;;  %s1058_s9 = smov 0   ;;  %s1060_s10 = smov 0  }
   0x5   :  { %s1062_s11 = smov 0   ;;  %s1064_s12 = smov 0  }
   0x6 LB: > { %s1079_s6 = sadd.s32 4294967295, %s1001_s12   ;;  %s803_s7 = sadd.s32 4294967294, %s1001_s12   ;;  %s1001_s12 = sphi %s1064_s12, %s1215_s12   ;;  %s997_s11 = sphi %s1062_s11, %s1214_s11   ;;  %s993_s10 = sphi %s1060_s10, %s1213_s10   ;;  %s989_s9 = sphi %s1058_s9, %s1212_s9  }
   0x7   : > { %s1083_s13 = sadd.s32 1, %s1001_s12   ;;  %s213_s14 = sadd.s32 1, %s997_s11 }
   0x8   : > { %s210_s15 = ssub.s32 %s1001_s12, %s1083_s13  ;;  %p223_p0 = scmp.ne.s32.totalorder %s997_s11, %s993_s10 }
   0x9   : > { %p211_p1 = scmp.eq.s32.totalorder %s210_s15, 0  ;;  %p224_p2 = scmp.eq.s32.totalorder %s1079_s6, 1 }
   0xa   : > { %p229_p3 = scmp.ne.s32.totalorder %s993_s10, %s989_s9  ;;  %p230_p4 = scmp.eq.s32.totalorder %s803_s7, 1 }
   0xb   : > { %s1094_s16 = scalar_select %p211_p1, %s997_s11, %s213_s14  }
   0xc   : > { %p1096_p5 = por %p224_p2, %p223_p0  ;;  %p1100_p6 = por %p230_p4, %p229_p3 }
   0xd   : > { %p806_p7 = scmp.ge.s32.totalorder %s1001_s12, 1  ;;  %p287_p8 = scmp.lt.s32.totalorder %s1001_s12, 3 }
   0xf   : > { %p288_p9 = pnand %p806_p7, %p287_p8 }
  0x10   : > { %p331_p10 = scmp.lt.s32.totalorder (!%p288_p9), %s1079_s6, 1  ;;  %s1107_s19 = sld [smem:[#allocation2]] (!%p288_p9) }
  0x11   : > { %291 = sbr.rel (%p288_p9) target bundleno = 457 (0x1c9), region = 52  ;;  %s328_s20 = sand.u32 (!%p288_p9), 1, %s993_s10  }
  0x12   : > { %s1004_s28 = smov (!%p288_p9), [#allocation4]  }
  0x16   : > { %v921_v0 = vld [vmem:[%s1204_s3] sm:$0xff]   ;;  %vm429_vm0 = vcmask 261120   ;;  %s332_s24 = scalar_select %p331_p10, %s1079_s6, 1  ;;  %v351_v13 = vstv %s1107_s19  ;;  %v923_v17 = vld [vmem:[%s1204_s3 + $0x8] sm:$0xff]   ;;  %vm560_vm1 = vcmask 130048  }
  0x17   : > { %v922_v1 = vld [vmem:[%s1205_s4] sm:$0xff]   ;;  %853 = vmatprep.mubr.msk.bf16.mxu0 %vm429_vm0, %v921_v0  ;;  %v924_v18 = vld [vmem:[%s1205_s4 + $0x8] sm:$0xff]   ;;  %s348_s19 = sld [smem:[#allocation3]] }
  0x18   : > { %861 = vmatprep.mubr.msk.bf16.mxu1 %vm429_vm0, %v922_v1  ;;  %s831_s25 = sshll.u32 %s332_s24, 4  ;;  %s833_s26 = sshll.u32 %s332_s24, 5 }
  0x19   : > { %s340_s29 = scalar_lea.vmem %s1202_s1, %s831_s25  ;;  %s335_s14 = scalar_lea.vmem %s1201_s0, %s831_s25 }
  0x1a   : > { %s345_s21 = scalar_lea.vmem %s1203_s2, %s833_s26  ;;  %v377_v2 = vld [vmem:[%s340_s29] sm:$0xff]  ;;  %v378_v3 = vld [vmem:[%s340_s29 + $0x8] sm:$0xff]  ;;  %s834_s24 = sshll.u32 %s1079_s6, 9 }
  0x1b   : > { %v379_v4 = vadd.f32 1.2e-05, %v377_v2  ;;  %v411_v5 = vld [vmem:[%s345_s21 + $0x10] sm:$0xff]  ;;  %v412_v6 = vld [vmem:[%s345_s21 + $0x18] sm:$0xff]  ;;  %v380_v7 = vadd.f32 1.2e-05, %v378_v3  ;;  %s1157_s26 = scalar_lea.hbm %s1209_s8, %s834_s24 }
  0x1c   : > { %v414_v8 = vpack.c.bf16 %v412_v6, %v411_v5  ;;  %v409_v9 = vld [vmem:[%s345_s21] sm:$0xff]  ;;  %v410_v10 = vld [vmem:[%s345_s21 + $0x8] sm:$0xff]  ;;  %s807_s21 = sshll.u32 %s328_s20, 5  ;;  %s1161_s6 = scalar_lea.sflag [#allocation5], %s328_s20 }
  0x1d   : > { %v349_v11 = vld [vmem:[%s335_s14] sm:$0xff]  ;;  %v350_v12 = vld [vmem:[%s335_s14 + $0x8] sm:$0xff]  ;;  %925 = vrcp.f32 %v379_v4  ;;  %v413_v14 = vpack.c.bf16 %v410_v10, %v409_v9  ;;  %v383_v21 = vstv %s348_s19  ;;  %v1003_v10 = vmov 0   ;;  %s330_s22 = scalar_lea.vmem [#allocation4], %s807_s21  ;;  %s945_s29 = sshll.u32 %s1004_s28, 4  ;;  %s946_s29 = int_to_ptr.vmem [resolvable:$false] %s945_s29 }
  0x1e   : > { %927 = vrcp.f32 %v380_v7  ;;  %849 = vmatprep.subr.bf16.mxu0 %v414_v8  ;;  %857 = vmatprep.subr.bf16.mxu1 %v414_v8  ;;  %v352_v15 = vmul.f32 %v351_v13, %v349_v11  ;;  %v353_v16 = vmul.f32 %v351_v13, %v350_v12  ;;  %v671_v9 = vld [vmem:[%s1206_s5] sm:$0xff]  ;;  %v674_v11 = vld [vmem:[%s1206_s5 + $0x18] sm:$0xff]  ;;  %v672_v12 = vld [vmem:[%s1206_s5 + $0x8] sm:$0xff]  ;;  %s717_s23 = sshll.u32 %s330_s22, 4  ;;  %s947_s30 = scalar_lea.vmem %s946_s29, 1024  ;;  %s1152_s23 = int_to_ptr.vmem [resolvable:$true] %s717_s23 }
  0x1f   : > { %850 = vmatpush3.bf16.msra.mxu0 %v414_v8  ;;  %858 = vmatpush3.bf16.msra.mxu1 %v414_v8  ;;  %v673_v8 = vld [vmem:[%s1206_s5 + $0x10] sm:$0xff]  ;;  %s941_s27 = scalar_lea.vmem %s1152_s23, 512  ;;  %p948_p0 = scmp.lt.s32.totalorder %s1152_s23, %s946_s29 }
  0x20   : > { %851 = vmatprep.subr.bf16.mxu0 %v413_v14  ;;  %859 = vmatprep.subr.bf16.mxu1 %v413_v14  ;;  %v354_v19 = vmax.f32 %v352_v15, %v353_v16  ;;  %p942_p11 = scmp.ne.s32.totalorder %s1152_s23, %s941_s27  ;;  %p949_p1 = scmp.lt.s32.totalorder %s947_s30, %s941_s27 }
  0x21   : > { %920 = vset.pattern.permute.xlu1 %v1003_v10  ;;  %919 = vset.pattern.permute.xlu0 %v1003_v10 }
  0x22   : > { %v355_v20 = vrot.slane %v354_v19, 4  ;;  %687 = vperm.xlu1 %920, %v673_v8   ;;  %677 = vperm.xlu0 %919, %v671_v9   ;;  %p943_p12 = pnand %p942_p11, %p1096_p5  ;;  %p950_p2 = por %p949_p1, %p948_p0 }
  0x23   : > { %852 = vmatpush3.bf16.msra.mxu0 %v413_v14  ;;  %860 = vmatpush3.bf16.msra.mxu1 %v413_v14 }
  0x24   : > { %v356_v25 = vmax.f32 %v354_v19, %v355_v20  ;;  %p944_p13 = pneg %p943_p12 }
  0x26   : > { %854 = vmatmul.mubr.msk.bf16.vlgmr.msra.gmra.mxu0 %vm429_vm0, %v923_v17  ;;  %862 = vmatmul.mubr.msk.bf16.vlgmr.msra.gmra.mxu1 %vm429_vm0, %v924_v18  ;;  %v357_v28 = vrot.slane %v356_v25, 2  ;;  %p951_p3 = pnand %p950_p2, %p944_p13 }
  0x27   : > { %692 = vperm.xlu1 %920, %v674_v11   ;;  %682 = vperm.xlu0 %919, %v672_v12  }
  0x28   : > { %v358_v32 = vmax.f32 %v356_v25, %v357_v28 }
  0x2a   : > { %v926_v22 = vpop.eup %925  ;;  %v359_v34 = vrot.slane %v358_v32, 1 }
  0x2b   : > { %v928_v23 = vpop.eup %927  ;;  %v384_v24 = vmul.f32 %v926_v22, %v383_v21 }
  0x2c   : > { %v385_v26 = vmul.f32 %v928_v23, %v383_v21  ;;  %v360_v36 = vmax.f32 %v358_v32, %v359_v34 }
  0x2e   : > { %v386_v27 = vmax.f32 %v384_v24, %v385_v26  ;;  %v361_v38 = vsub.f32 %v352_v15, %v360_v36  ;;  %v362_v39 = vsub.f32 %v353_v16, %v360_v36 }
  0x30   : > { %v387_v29 = vrot.slane %v386_v27, 4  ;;  %v363_v42 = vmul.f32 1.442695, %v361_v38  ;;  %v365_v43 = vmul.f32 1.442695, %v362_v39 }
  0x32   : > { %v388_v30 = vmax.f32 %v386_v27, %v387_v29  ;;  %929 = vpow2.f32 %v363_v42 }
  0x33   : > { %931 = vpow2.f32 %v365_v43 }
  0x34   : > { %v389_v31 = vrot.slane %v388_v30, 2 }
  0x36   : > { %v390_v33 = vmax.f32 %v388_v30, %v389_v31 }
  0x38   : > { %v391_v35 = vrot.slane %v390_v33, 1 }
  0x3a   : > { %v392_v37 = vmax.f32 %v390_v33, %v391_v35 }
  0x3c   : > { %v393_v40 = vsub.f32 %v384_v24, %v392_v37  ;;  %v394_v41 = vsub.f32 %v385_v26, %v392_v37 }
  0x3e   : > { %v395_v44 = vmul.f32 1.442695, %v393_v40  ;;  %v397_v45 = vmul.f32 1.442695, %v394_v41 }
  0x3f   : > { %v930_v46 = vpop.eup %929 }
  0x40   : > { %933 = vpow2.f32 %v395_v44  ;;  %v932_v47 = vpop.eup %931 }
  0x41   : > { %935 = vpow2.f32 %v397_v45  ;;  %v367_v49 = vadd.f32 %v932_v47, %v930_v46 }
  0x43   : > { %v368_v52 = vrot.slane %v367_v49, 4 }
  0x45   : > { %v369_v54 = vadd.f32 %v368_v52, %v367_v49 }
  0x47   : > { %v370_v56 = vrot.slane %v369_v54, 2 }
  0x49   : > { %v371_v58 = vadd.f32 %v370_v56, %v369_v54 }
  0x4b   : > { %v372_v60 = vrot.slane %v371_v58, 1 }
  0x4d   : > { %v934_v48 = vpop.eup %933  ;;  %v373_v62 = vadd.f32 %v372_v60, %v371_v58 }
  0x4e   : > { %v936_v50 = vpop.eup %935 }
  0x4f   : > { %v399_v51 = vadd.f32 %v936_v50, %v934_v48  ;;  %937 = vrcp.f32 %v373_v62 }
  0x51   : > { %v400_v53 = vrot.slane %v399_v51, 4 }
  0x53   : > { %v401_v55 = vadd.f32 %v400_v53, %v399_v51 }
  0x55   : > { %v402_v57 = vrot.slane %v401_v55, 2 }
  0x57   : > { %v403_v59 = vadd.f32 %v402_v57, %v401_v55 }
  0x59   : > { %v404_v61 = vrot.slane %v403_v59, 1 }
  0x5b   : > { %v405_v63 = vadd.f32 %v404_v61, %v403_v59 }
  0x5c   : > { %v938_v0 = vpop.eup %937 }
  0x5d   : > { %939 = vrcp.f32 %v405_v63  ;;  %v375_v1 = vmul.f32 %v938_v0, %v930_v46  ;;  %v376_v2 = vmul.f32 %v938_v0, %v932_v47 }
  0x5f   : > { %v556_v6 = vpack.c.bf16 %v376_v2, %v375_v1 }
  0x61   : > { %871 = vmatprep.subr.bf16.mxu1 %v556_v6 }
  0x62   : > { %872 = vmatpush3.bf16.msra.mxu1 %v556_v6 }
  0x6a   : > { %v940_v3 = vpop.eup %939 }
  0x6b   : > { %v407_v4 = vmul.f32 %v940_v3, %v934_v48  ;;  %v408_v5 = vmul.f32 %v940_v3, %v936_v50 }
  0x6d   : > { %v559_v7 = vpack.c.bf16 %v408_v5, %v407_v4 }
  0x6f   : > { %865 = vmatprep.subr.bf16.mxu0 %v559_v7 }
  0x70   : > { %866 = vmatpush3.bf16.msra.mxu0 %v559_v7 }
  0x9d   : > { %v688_v25 = vpop.permute.xlu1 %687  ;;  %v678_v28 = vpop.permute.xlu0 %677 }
  0xa2   : > { %v693_v37 = vpop.permute.xlu1 %692  ;;  %v683_v43 = vpop.permute.xlu0 %682 }
  0xe6   : > { %v855_v13 = vpop.f32.mrf.mxu0  ;;  %v863_v14 = vpop.f32.mrf.mxu1 }
  0xe8   : > { %v470_v15 = vpop.f32.mrf.mxu0  ;;  %v539_v16 = vpop.f32.mrf.mxu1 }
  0xea   : > { %v856_v17 = vpop.f32.mrf.mxu0  ;;  %v864_v18 = vpop.f32.mrf.mxu1 }
  0xeb   : > { %v555_v23 = vpack.c.bf16 %v856_v17, %v855_v13  ;;  %v558_v24 = vpack.c.bf16 %v864_v18, %v863_v14 }
  0xec   : > { %v473_v19 = vpop.f32.mrf.mxu0  ;;  %v542_v20 = vpop.f32.mrf.mxu1 }
  0xed   : > { %v554_v21 = vpack.c.bf16 %v473_v19, %v470_v15  ;;  %v557_v22 = vpack.c.bf16 %v542_v20, %v539_v16 }
  0xef   : > { %867 = vmatprep.mubr.msk.bf16.mxu0 %vm560_vm1, %v557_v22  ;;  %873 = vmatprep.mubr.msk.bf16.mxu1 %vm560_vm1, %v554_v21 }
  0xf0   : > { %868 = vmatmul.mubr.msk.bf16.vlgmr.msra.gmra.mxu0 %vm560_vm1, %v558_v24  ;;  %874 = vmatmul.mubr.msk.bf16.vlgmr.msra.gmra.mxu1 %vm560_vm1, %v555_v23 }
 0x1b0   : > { %v869_v26 = vpop.f32.mrf.mxu0  ;;  %v875_v27 = vpop.f32.mrf.mxu1 }
 0x1b1   : > { %v665_v29 = vadd.f32 %v875_v27, %v869_v26 }
 0x1b2   : > { %v601_v30 = vpop.f32.mrf.mxu0  ;;  %v656_v31 = vpop.f32.mrf.mxu1 }
 0x1b3   : > { %v697_v32 = vadd.f32 %v688_v25, %v665_v29  ;;  %v657_v33 = vadd.f32 %v656_v31, %v601_v30 }
 0x1b4   : > { %v870_v34 = vpop.f32.mrf.mxu0  ;;  %v876_v35 = vpop.f32.mrf.mxu1 }
 0x1b5   : > { %701 = vst [vmem:[%s330_s22 + $0x10] sm:$0xff] %v697_v32  ;;  %v695_v36 = vadd.f32 %v678_v28, %v657_v33  ;;  %v668_v38 = vadd.f32 %v876_v35, %v870_v34 }
 0x1b6   : > { %v604_v39 = vpop.f32.mrf.mxu0  ;;  %v659_v40 = vpop.f32.mrf.mxu1 }
 0x1b7   : > { %699 = vst [vmem:[%s330_s22] sm:$0xff] %v695_v36  ;;  %v698_v41 = vadd.f32 %v693_v37, %v668_v38  ;;  %v660_v42 = vadd.f32 %v659_v40, %v604_v39 }
 0x1b9   : > { %702 = vst [vmem:[%s330_s22 + $0x18] sm:$0xff] %v698_v41  ;;  %v696_v44 = vadd.f32 %v683_v43, %v660_v42 }
 0x1bb   : > { %700 = vst [vmem:[%s330_s22 + $0x8] sm:$0xff] %v696_v44 }
 0x1bc   : > { %954 = shalt.err (!%p951_p3)
}
 0x1bd   : > { %s955_s7 = scalar_lea.hbm %s1157_s26, 512  ;;  %s959_s20 = scalar_lea.hbm %s1209_s8, 1024 }
 0x1be   : > { %p956_p4 = scmp.ne.s32.totalorder %s1157_s26, %s955_s7  ;;  %p960_p9 = scmp.lt.s32.totalorder %s1157_s26, %s1209_s8 }
 0x1bf   : > { %p961_p10 = scmp.lt.s32.totalorder %s959_s20, %s955_s7 }
 0x1c0   : > { %p957_p7 = pnand %p956_p4, %p1096_p5 }
 0x1c1   : > { %p962_p11 = por %p961_p10, %p960_p9 }
 0x1c2   : > { %p958_p8 = pneg %p957_p7 }
 0x1c4   : > { %p963_p12 = pnand %p962_p11, %p958_p8 }
 0x1c6   : > { %966 = shalt.err (!%p963_p12)
}
 0x1c7   : > { %s1005_s24 = smov 128   ;;  %s1006_s25 = smov 8  }
 0x1c8   : > { %877 = dma.vmem_to_hbm [thread:$0]  (%p1096_p5), %s1152_s23, 512, %s1157_s26, %s1161_s6, %s1005_s24, %s1005_s24, %s1006_s25  }
 0x1c9 PF: > { %p883_p13 = scmp.ge.s32.totalorder %s1001_s12, 2  ;;  %s732_s19 = sand.u32 1, %s989_s9  }
 0x1ca   : > { %s733_s27 = scalar_lea.sflag [#allocation5], %s732_s19 }
 0x1cb   : > { %p880_p0 = pnand %p883_p13, %p1100_p6 }
 0x1cd   : > { %p881_p1 = pneg %p880_p0 }
 0x1cf   : > { %984 = dma.done.wait (%p881_p1), %s733_s27, 512  }
 0x1d0   : > { %986 = vsyncadd (%p881_p1), %s733_s27, 4294966784  ;;  %p20_p2 = scmp.ge.s32.totalorder %s1083_s13, 4   ;;  %s1212_s9 = smov %s993_s10 }
 0x1d1   : > { %s1213_s10 = smov %s997_s11  ;;  %s1214_s11 = smov %s1094_s16 }
 0x1d2   : > { %s1215_s12 = smov %s1083_s13  ;;  %22 = sbr.rel (!%p20_p2) target bundleno = 6 (0x6), region = 93 }
 0x1d7   :  { %738 = vsyncpa [#allocation5], 1 }
 0x1d8   :  { %740 = vsyncpa [#allocation5 + $0x1], 1 }

</bundles_post_ra>
